<compile_context>
chip_gen: v7x
topology: tpu7x:2x2x1
jax: 0.10.0
libtpu: 0.0.40
codegen_flags: <defaults>
</compile_context>

<pallas_src>
import jax
import jax.numpy as jnp
from jax.experimental import pallas as pl
from jax.experimental.pallas import tpu as pltpu

_LANE = 512   # lane-axis slab width (multiple of 128)
_SUB = 8      # sublane granularity


def fused_mlp_kernel(params_ref, x_ref, o_ref):
    """params_ref: SMEM (3,) = [w0, w1, b];
    x_ref: VMEM (2, R, L) feature-major batch slab; o_ref: VMEM (R, L)."""
    w0 = params_ref[0]
    w1 = params_ref[1]
    b = params_ref[2]
    x0 = x_ref[0]                      # (R, L): feature 0, 8x128-dense
    x1 = x_ref[1]                      # (R, L): feature 1, 8x128-dense
    o_ref[...] = x0 * w0 + x1 * w1 + b


def _block_rows(batch, max_block_rows=512):
    """Pick slab/block sizing: rows multiple of 8, grid >= 2 when possible."""
    rows_needed = pl.cdiv(batch, _LANE)
    r_blk = min(max_block_rows, rows_needed)
    r_blk = max(_SUB, pl.cdiv(r_blk, _SUB) * _SUB)
    n_blocks = pl.cdiv(rows_needed, r_blk)
    if n_blocks < 2 and rows_needed > _SUB:
        # split into >= 2 blocks so a v7x megacore can shard the grid
        r_blk = max(_SUB, pl.cdiv(pl.cdiv(rows_needed, 2), _SUB) * _SUB)
        n_blocks = pl.cdiv(rows_needed, r_blk)
    rows = n_blocks * r_blk
    return rows, r_blk, n_blocks


def binary_classification_forward(x, w1, b1, w2, b2):
    """x: (B, 2); w1: (2, 10); b1: (1, 10); w2: (10, 1); b2: (1, 1) -> (B, 1)."""
    B = x.shape[0]

    # Exact algebraic fusion of the two linear layers (plain JAX, once).
    w_fused = (w1 @ w2).astype(jnp.float32)                 # (2, 1)
    b_fused = (b1 @ w2 + b2).astype(jnp.float32)            # (1, 1)
    params = jnp.concatenate([w_fused[:, 0], b_fused[0]])   # (3,) = [w0, w1, b]

    # Feature-major, 8x128-dense slab layout: (2, ROWS, LANE).
    rows, r_blk, n_blocks = _block_rows(B)
    b_pad = rows * _LANE
    # One fused relayout pass under jit (cast + transpose + pad + reshape).
    xt = jnp.pad(x.astype(jnp.float32).T, ((0, 0), (0, b_pad - B)))
    x_slab = xt.reshape(2, rows, _LANE)

    out_slab = pl.pallas_call(
        fused_mlp_kernel,
        out_shape=jax.ShapeDtypeStruct((rows, _LANE), jnp.float32),
        grid=(n_blocks,),
        in_specs=[
            pl.BlockSpec(memory_space=pltpu.MemorySpace.SMEM),       # [w0, w1, b]
            pl.BlockSpec((2, r_blk, _LANE), lambda i: (0, i, 0)),    # batch slab
        ],
        out_specs=pl.BlockSpec((r_blk, _LANE), lambda i: (i, 0)),    # dense output
        compiler_params=pltpu.CompilerParams(
            dimension_semantics=("parallel",),       # megacore-shardable on v7x
            vmem_limit_bytes=32 * 1024 * 1024,       # headroom on v5e defaults
        ),
    )(params, x_slab)

    # Padded tail lanes hold bias-only garbage; slice back to the valid batch.
    return out_slab.reshape(b_pad)[:B].reshape(B, 1)


def init_params(key):
    """Deterministic parameter init matching nn.Linear shapes.

    PyTorch stores weight as (out, in); we keep them transposed as (in, out)
    for direct use in `x @ W + b`.
    """
    k1, k2, k3, k4 = jax.random.split(key, 4)
    in1, hid, out = 2, 10, 1
    lim1 = 1.0 / jnp.sqrt(jnp.float32(in1))
    lim2 = 1.0 / jnp.sqrt(jnp.float32(hid))
    w1 = jax.random.uniform(k1, (in1, hid), jnp.float32, -lim1, lim1)
    b1 = jax.random.uniform(k2, (1, hid), jnp.float32, -lim1, lim1)
    w2 = jax.random.uniform(k3, (hid, out), jnp.float32, -lim2, lim2)
    b2 = jax.random.uniform(k4, (1, out), jnp.float32, -lim2, lim2)
    return w1, b1, w2, b2


if __name__ == "__main__":
    key = jax.random.PRNGKey(0)
    kx, kp, kx2 = jax.random.split(key, 3)

    w1, b1, w2, b2 = init_params(kp)
    forward = jax.jit(binary_classification_forward)

    # Small-batch check (single slab, padded rows/lanes).
    batch = 8
    x = jax.random.normal(kx, (batch, 2), jnp.float32)
    out = jax.block_until_ready(forward(x, w1, b1, w2, b2))
    ref = (x @ w1 + b1) @ w2 + b2
    assert out.shape == (batch, 1), out.shape
    assert jnp.allclose(out, ref, atol=1e-5, rtol=1e-5), (out, ref)

    # Non-multiple batch check (exercises slab padding + tail slice).
    batch2 = 1000
    x2 = jax.random.normal(kx2, (batch2, 2), jnp.float32)
    out2 = jax.block_until_ready(forward(x2, w1, b1, w2, b2))
    ref2 = (x2 @ w1 + b1) @ w2 + b2
    assert out2.shape == (batch2, 1), out2.shape
    assert jnp.allclose(out2, ref2, atol=1e-5, rtol=1e-5)

    print("KERNEL_OK")
</pallas_src>

<mosaic_0001>
module attributes {stable_mosaic.version = 11 : i64} {
  func.func @fused_mlp_kernel(%arg0: i32, %arg1: memref<3xf32, #tpu.memory_space<smem>>, %arg2: memref<2x8x512xf32, #tpu.memory_space<vmem>>, %arg3: memref<8x512xf32, #tpu.memory_space<vmem>>) attributes {dimension_semantics = [#tpu.dimension_semantics<parallel>], iteration_bounds = array<i64: 1>, scalar_prefetch = 0 : i64, scratch_operands = 0 : i64, tpu.core_type = #tpu.core_type<tc>, window_params = [{transform_indices = @transform_0, window_bounds = array<i64: 3>}, {transform_indices = @transform_1, window_bounds = array<i64: 2, 8, 512>}, {transform_indices = @transform_2, window_bounds = array<i64: 8, 512>}]} {
    %c0 = arith.constant 0 : index
    %0 = memref.load %arg1[%c0] : memref<3xf32, #tpu.memory_space<smem>>
    %c1 = arith.constant 1 : index
    %1 = memref.load %arg1[%c1] : memref<3xf32, #tpu.memory_space<smem>>
    %c2 = arith.constant 2 : index
    %2 = memref.load %arg1[%c2] : memref<3xf32, #tpu.memory_space<smem>>
    %c0_0 = arith.constant 0 : index
    %c0_1 = arith.constant 0 : index
    %c0_2 = arith.constant 0 : index
    %3 = vector.load %arg2[%c0_0, %c0_1, %c0_2] : memref<2x8x512xf32, #tpu.memory_space<vmem>>, vector<1x8x512xf32>
    %4 = vector.shape_cast %3 : vector<1x8x512xf32> to vector<8x512xf32>
    %c1_3 = arith.constant 1 : index
    %c0_4 = arith.constant 0 : index
    %c0_5 = arith.constant 0 : index
    %5 = vector.load %arg2[%c1_3, %c0_4, %c0_5] : memref<2x8x512xf32, #tpu.memory_space<vmem>>, vector<1x8x512xf32>
    %6 = vector.shape_cast %5 : vector<1x8x512xf32> to vector<8x512xf32>
    %7 = vector.broadcast %0 : f32 to vector<8x512xf32>
    %8 = arith.mulf %4, %7 : vector<8x512xf32>
    %9 = vector.broadcast %1 : f32 to vector<8x512xf32>
    %10 = arith.mulf %6, %9 : vector<8x512xf32>
    %11 = arith.addf %8, %10 : vector<8x512xf32>
    %12 = vector.broadcast %2 : f32 to vector<8x512xf32>
    %13 = arith.addf %11, %12 : vector<8x512xf32>
    %c0_6 = arith.constant 0 : index
    %c0_7 = arith.constant 0 : index
    %14 = vector.load %arg3[%c0_6, %c0_7] : memref<8x512xf32, #tpu.memory_space<vmem>>, vector<8x512xf32>
    tpu.vector_store %arg3[%c0_6, %c0_7], %13 {strides = array<i32>} : memref<8x512xf32, #tpu.memory_space<vmem>>, vector<8x512xf32>,
    return
  }
  func.func @transform_0(%arg0: i32) -> i32 {
    %c0_i32 = arith.constant 0 : i32
    %c0_i32_0 = arith.constant 0 : i32
    return %c0_i32 : i32
  }
  func.func @transform_1(%arg0: i32) -> (i32, i32, i32) {
    %c0_i32 = arith.constant 0 : i32
    %c0_i32_0 = arith.constant 0 : i32
    %c0_i32_1 = arith.constant 0 : i32
    return %c0_i32, %arg0, %c0_i32_0 : i32, i32, i32
  }
  func.func @transform_2(%arg0: i32) -> (i32, i32) {
    %c0_i32 = arith.constant 0 : i32
    %c0_i32_0 = arith.constant 0 : i32
    return %arg0, %c0_i32 : i32, i32
  }
}

</mosaic_0001>

<bundles_post_ra>
// kernel: binary_classification_forward.1
= control target key start
LH: loop header
LB: loop body
LE: loop exit
PB: predicated region body
PF: predicated region fallthrough
CT: control target
= control target key end

     0   :  { %7 = vsyncpa [#allocation3], 0  ;;  %s140_s0 = inlined_call_operand.vmem [shape: f32[3], index: 0, kind: input, shape index: {}]   ;;  %s141_s1 = inlined_call_operand.vmem [shape: f32[2,8,512], index: 1, kind: input, shape index: {}]   ;;  %s142_s2 = inlined_call_operand.vmem [shape: f32[8,512], index: 2, kind: output, shape index: {}]  }
   0x1   :  { %s14_s11 = sshll.u32 %s140_s0, 4  ;;  %s15_s11 = int_to_ptr.vmem [resolvable:$true] %s14_s11 }
   0x2   :  { %s71_s12 = scalar_lea.vmem %s15_s11, 16  ;;  %p76_p1 = scmp.lt.s32.totalorder %s15_s11, %s15_s11 }
   0x3   :  { %p72_p0 = scmp.ne.s32.totalorder %s15_s11, %s71_s12  ;;  %p77_p2 = scmp.lt.s32.totalorder %s71_s12, %s71_s12 }
   0x5   :  { %p78_p3 = por %p77_p2, %p76_p1 }
   0x7   :  { %p79_p4 = pnand %p78_p3, %p72_p0 }
   0x9   :  { %82 = shalt.err (!%p79_p4)
}
   0xa   :  { %s85_s13 = smov [#allocation2]  }
   0xb   :  { %17 = dma.vmem_to_smem %s15_s11, 16, %s85_s13, [#allocation3]  }
   0xc   :  { %83 = dma.done.wait [#allocation3], 16  }
   0xd   :  { %84 = vsyncadd [#allocation3], 4294967280 }
   0xe   :  { %23 = sfence }
   0xf   :  { %s24_s14 = sld [smem:[#allocation2]]  ;;  %s64_s15 = sld [smem:[#allocation2 + $0x1]]  ;;  %v27_v0 = vld [vmem:[%s141_s1] sm:$0xff]  ;;  %v28_v2 = vld [vmem:[%s141_s1 + $0x8] sm:$0xff]  ;;  %v29_v4 = vld [vmem:[%s141_s1 + $0x10] sm:$0xff] }
  0x10   :  { %s65_s16 = sld [smem:[#allocation2 + $0x2]]  ;;  %v66_v1 = vld [vmem:[%s141_s1 + $0x20] sm:$0xff]  ;;  %v67_v3 = vld [vmem:[%s141_s1 + $0x28] sm:$0xff]  ;;  %v68_v5 = vld [vmem:[%s141_s1 + $0x30] sm:$0xff] }
  0x11   :  { %v30_v6 = vld [vmem:[%s141_s1 + $0x18] sm:$0xff] }
  0x12   :  { %v69_v9 = vld [vmem:[%s141_s1 + $0x38] sm:$0xff] }
  0x15   :  { %v36_v7 = vstv %s24_s14  ;;  %v41_v8 = vstv %s64_s15 }
  0x16   :  { %v37_v10 = vmul.f32 %v36_v7, %v27_v0  ;;  %v42_v11 = vmul.f32 %v66_v1, %v41_v8  ;;  %v50_v12 = vstv %s65_s16  ;;  %v38_v13 = vmul.f32 %v36_v7, %v28_v2 }
  0x17   :  { %v43_v14 = vmul.f32 %v67_v3, %v41_v8  ;;  %v39_v15 = vmul.f32 %v36_v7, %v29_v4  ;;  %v44_v16 = vmul.f32 %v68_v5, %v41_v8  ;;  %v40_v17 = vmul.f32 %v36_v7, %v30_v6 }
  0x18   :  { %v46_v18 = vadd.f32 %v42_v11, %v37_v10  ;;  %v45_v19 = vmul.f32 %v69_v9, %v41_v8 }
  0x19   :  { %v47_v20 = vadd.f32 %v43_v14, %v38_v13  ;;  %v48_v21 = vadd.f32 %v44_v16, %v39_v15 }
  0x1a   :  { %v51_v22 = vadd.f32 %v50_v12, %v46_v18  ;;  %v49_v23 = vadd.f32 %v45_v19, %v40_v17 }
  0x1b   :  { %v52_v24 = vadd.f32 %v50_v12, %v47_v20  ;;  %v53_v25 = vadd.f32 %v50_v12, %v48_v21 }
  0x1c   :  { %55 = vst [vmem:[%s142_s2] sm:$0xff] %v51_v22  ;;  %v54_v26 = vadd.f32 %v50_v12, %v49_v23 }
  0x1d   :  { %56 = vst [vmem:[%s142_s2 + $0x8] sm:$0xff] %v52_v24  ;;  %57 = vst [vmem:[%s142_s2 + $0x10] sm:$0xff] %v53_v25 }
  0x1e   :  { %58 = vst [vmem:[%s142_s2 + $0x18] sm:$0xff] %v54_v26 }
  0x1f   :  { %63 = vsyncpa [#allocation3], 1 }

</bundles_post_ra>
